<compile_context>
chip_gen: v7x
topology: tpu7x:2x2x1
jax: 0.10.0
libtpu: 0.0.40
codegen_flags: <defaults>
</compile_context>

<pallas_src>
import functools

import jax
import jax.numpy as jnp
from jax.experimental import pallas as pl
from jax.experimental.pallas import tpu as pltpu

EPS = 1e-5   # BatchNorm2d eps


def _full_spec(shape):
    nd = len(shape)
    return pl.BlockSpec(shape, lambda *_: (0,) * nd)


# ------------------ ConvTranspose2d -> im2col matmul helpers -----------------
def convt_im2col(h_flat, B, H, W, C, K, stride, pad):
    """im2col of the fractionally-strided-conv equivalent of ConvTranspose2d.

    h_flat: (B*H*W, C) NHWC-flat input.  Returns (B, Ho, Wo, K*K*C) columns ordered
    (ki, kj, ci), plus Ho/Wo.
    """
    x = h_flat.reshape(B, H, W, C).astype(jnp.float32)
    epad = K - 1 - pad
    interior = stride - 1
    xp = jax.lax.pad(
        x, jnp.array(0.0, x.dtype),
        ((0, 0, 0), (epad, epad, interior), (epad, epad, interior), (0, 0, 0)))
    Hd = (H - 1) * stride + 1 + 2 * epad
    Wd = (W - 1) * stride + 1 + 2 * epad
    Ho, Wo = Hd - K + 1, Wd - K + 1
    slabs = []
    for ki in range(K):
        for kj in range(K):
            slabs.append(xp[:, ki:ki + Ho, kj:kj + Wo, :])
    col = jnp.concatenate(slabs, axis=-1)            # (B, Ho, Wo, K*K*C)
    return col, Ho, Wo


def convt_weight(w):
    """PyTorch ConvTranspose2d weight (Cin, Cout, K, K) -> (K*K*Cin, Cout), spatially
    flipped, rows ordered (ki, kj, ci) to match convt_im2col columns."""
    Cin, Cout, K, _ = w.shape
    return jnp.flip(w, axis=(2, 3)).transpose(2, 3, 0, 1).reshape(K * K * Cin, Cout)


# --------------- fused conv-matmul + BatchNorm(batch) + ReLU kernel ----------
def _convt_bn_relu_kernel(col_ref, w_ref, gw_ref, gb_ref, o_ref, *, inv_n, eps):
    y = jnp.dot(col_ref[...], w_ref[...], preferred_element_type=jnp.float32)  # (M, C)
    m = jnp.sum(y, axis=0, keepdims=True) * inv_n
    yc = y - m
    var = jnp.sum(yc * yc, axis=0, keepdims=True) * inv_n     # biased, as in PyTorch BN fwd
    yn = yc * jax.lax.rsqrt(var + eps) * gw_ref[...] + gb_ref[...]
    o_ref[...] = jnp.maximum(yn, 0.0)                          # ReLU


def convt_bn_relu(col, wf, gw, gb):
    M, K = col.shape
    C = wf.shape[1]
    kern = functools.partial(_convt_bn_relu_kernel, inv_n=1.0 / M, eps=EPS)
    return pl.pallas_call(
        kern,
        out_shape=jax.ShapeDtypeStruct((M, C), jnp.float32),
        grid=(1,),
        in_specs=[_full_spec((M, K)), _full_spec((K, C)),
                  _full_spec((1, C)), _full_spec((1, C))],
        out_specs=_full_spec((M, C)),
    )(col.astype(jnp.float32), wf.astype(jnp.float32),
      gw.reshape(1, C).astype(jnp.float32), gb.reshape(1, C).astype(jnp.float32))


# ----- fused final block: conv-matmul + Self_Attn + residual + Softmax2d -----
def _final_attn_kernel(col_ref, colt_ref, wf_ref, wft_ref, wq_ref, wk_ref,
                       wvt_ref, bv_ref, scal_ref, o_ref):
    col = col_ref[0]                                 # (N, K)  im2col rows (h, w)
    colt = colt_ref[0]                               # (K, N)
    x = jnp.dot(col, wf_ref[...], preferred_element_type=jnp.float32)     # (N, C)
    xt = jnp.dot(wft_ref[...], colt, preferred_element_type=jnp.float32)  # (C, N) lane-dense
    gamma = scal_ref[0]
    bq = scal_ref[1]
    bk = scal_ref[2]
    # query/key 1x1 convs have a single output channel (nc // 8 == 1): VPU broadcast
    # multiply + channel reduce instead of 1-wide MXU matmuls.
    q = jnp.sum(x * wq_ref[...], axis=1, keepdims=True) + bq   # (N, 1)
    k = jnp.sum(xt * wk_ref[...], axis=0, keepdims=True) + bk  # (1, N)
    energy = q * k                                              # (N, N) outer product (VPU)
    energy = energy - jnp.max(energy, axis=-1, keepdims=True)
    e = jnp.exp(energy)
    attn = e * pl.reciprocal(jnp.sum(e, axis=-1, keepdims=True), approx=True)
    v = jnp.dot(x, wvt_ref[...], preferred_element_type=jnp.float32) + bv_ref[...]  # (N, C)
    out = jnp.dot(attn, v, preferred_element_type=jnp.float32)  # == bmm(v, attn^T) in NCHW
    y = gamma * out + x                                          # Self_Attn residual
    # Softmax2d == softmax over the channel axis at each spatial position.
    y = y - jnp.max(y, axis=1, keepdims=True)
    ey = jnp.exp(y)
    o_ref[0] = ey / jnp.sum(ey, axis=1, keepdims=True)


def final_convt_attn_softmax(col, colt, wf, wq_row, wk_col, wvt, bv_row, scal):
    B, N, K = col.shape
    C = wf.shape[1]
    wft = wf.T
    return pl.pallas_call(
        _final_attn_kernel,
        out_shape=jax.ShapeDtypeStruct((B, N, C), jnp.float32),
        grid=(B,),
        in_specs=[
            pl.BlockSpec((1, N, K), lambda b: (b, 0, 0)),
            pl.BlockSpec((1, K, N), lambda b: (b, 0, 0)),
            pl.BlockSpec((K, C), lambda b: (0, 0)),
            pl.BlockSpec((C, K), lambda b: (0, 0)),
            pl.BlockSpec((1, C), lambda b: (0, 0)),
            pl.BlockSpec((C, 1), lambda b: (0, 0)),
            pl.BlockSpec((C, C), lambda b: (0, 0)),
            pl.BlockSpec((1, C), lambda b: (0, 0)),
            pl.BlockSpec(memory_space=pltpu.MemorySpace.SMEM),   # [gamma, bq, bk]
        ],
        out_specs=pl.BlockSpec((1, N, C), lambda b: (b, 0, 0)),
        compiler_params=pltpu.CompilerParams(dimension_semantics=("parallel",)),
    )(col.astype(jnp.float32), colt.astype(jnp.float32), wf.astype(jnp.float32),
      wft.astype(jnp.float32), wq_row, wk_col, wvt, bv_row, scal)


# ------------------------------ full forward ---------------------------------
def generator_forward(z, p):
    B, nz = z.shape
    f32 = jnp.float32
    z = z.astype(f32)                                  # == (B, nz, 1, 1) NHWC-flat

    # ---- [0] initial: ConvT(nz->cngf, 4, s1, p0) + BN + ReLU ---------------
    cngf = p['w0'].shape[1]
    col0, H1, _ = convt_im2col(z, B, 1, 1, nz, K=4, stride=1, pad=0)
    col0 = col0.reshape(B * H1 * H1, -1)
    h1_flat = convt_bn_relu(col0, convt_weight(p['w0']), p['bn0_w'], p['bn0_b'])

    # ---- [1] pyramid: ConvT(cngf->cngf//2, 4, s2, p1) + BN + ReLU ----------
    c2 = p['w1'].shape[1]
    col1, H2, _ = convt_im2col(h1_flat, B, H1, H1, cngf, K=4, stride=2, pad=1)
    col1 = col1.reshape(B * H2 * H2, -1)
    h2_flat = convt_bn_relu(col1, convt_weight(p['w1']), p['bn1_w'], p['bn1_b'])

    # ---- [2] final: ConvT(c2->nc, 4, s2, p1) + Self_Attn(nc) + Softmax2d ---
    nc = p['w2'].shape[1]
    assert p['wq'].shape[0] == 1, "Self_Attn lowering assumes nc // 8 == 1"
    col2, H3, _ = convt_im2col(h2_flat, B, H2, H2, c2, K=4, stride=2, pad=1)
    N = H3 * H3
    col2 = col2.reshape(B, N, 16 * c2)                 # (B, 256, 128)
    col2t = col2.transpose(0, 2, 1)                    # lane-dense copy for the key path
    wq_row = p['wq'].reshape(1, nc).astype(f32)
    wk_col = p['wk'].reshape(nc, 1).astype(f32)
    wvt = p['wv'].reshape(nc, nc).T.astype(f32)
    bv_row = p['bv'].reshape(1, nc).astype(f32)
    scal = jnp.concatenate([p['gamma'], p['bq'], p['bk']]).astype(f32)   # (3,) SMEM
    out_flat = final_convt_attn_softmax(col2, col2t, convt_weight(p['w2']),
                                        wq_row, wk_col, wvt, bv_row, scal)

    # Convert to NCHW only for the tensors returned to the caller.
    h1 = h1_flat.reshape(B, H1, H1, cngf).transpose(0, 3, 1, 2)
    h2 = h2_flat.reshape(B, H2, H2, c2).transpose(0, 3, 1, 2)
    out = out_flat.reshape(B, H3, H3, nc).transpose(0, 3, 1, 2)
    return out, [h1, h2, out]


# ---------------------------- pure-JAX reference -----------------------------
def _convt_ref(x, w, stride, pad):
    K = w.shape[2]
    rhs = jnp.flip(w, (2, 3)).transpose(1, 0, 2, 3)    # (Cout, Cin, K, K)
    return jax.lax.conv_general_dilated(
        x, rhs, window_strides=(1, 1),
        padding=((K - 1 - pad,) * 2, (K - 1 - pad,) * 2),
        lhs_dilation=(stride, stride),
        dimension_numbers=('NCHW', 'OIHW', 'NCHW'),
        precision=jax.lax.Precision.HIGHEST)


def _conv1x1_ref(x, w, b):
    y = jax.lax.conv_general_dilated(
        x, w, (1, 1), ((0, 0), (0, 0)),
        dimension_numbers=('NCHW', 'OIHW', 'NCHW'),
        precision=jax.lax.Precision.HIGHEST)
    return y + b.reshape(1, -1, 1, 1)


def _bn_ref(x, w, b):
    m = x.mean(axis=(0, 2, 3), keepdims=True)
    v = ((x - m) ** 2).mean(axis=(0, 2, 3), keepdims=True)
    return (x - m) / jnp.sqrt(v + EPS) * w.reshape(1, -1, 1, 1) + b.reshape(1, -1, 1, 1)


def _self_attn_ref(x, wq, bq, wk, bk, wv, bv, gamma):
    b, c, h, w = x.shape
    q = _conv1x1_ref(x, wq, bq).reshape(b, -1, h * w).transpose(0, 2, 1)
    k = _conv1x1_ref(x, wk, bk).reshape(b, -1, h * w)
    energy = jnp.einsum('bnc,bcm->bnm', q, k, precision=jax.lax.Precision.HIGHEST)
    attn = jax.nn.softmax(energy, axis=-1)
    v = _conv1x1_ref(x, wv, bv).reshape(b, -1, h * w)
    out = jnp.einsum('bcn,bmn->bcm', v, attn, precision=jax.lax.Precision.HIGHEST)
    return gamma * out.reshape(b, c, h, w) + x


def generator_ref(z, p):
    x = z.reshape(z.shape[0], z.shape[1], 1, 1)
    h1 = jnp.maximum(_bn_ref(_convt_ref(x, p['w0'], 1, 0), p['bn0_w'], p['bn0_b']), 0.0)
    h2 = jnp.maximum(_bn_ref(_convt_ref(h1, p['w1'], 2, 1), p['bn1_w'], p['bn1_b']), 0.0)
    h3 = _convt_ref(h2, p['w2'], 2, 1)
    h3 = _self_attn_ref(h3, p['wq'], p['bq'], p['wk'], p['bk'],
                        p['wv'], p['bv'], p['gamma'])
    out = jax.nn.softmax(h3, axis=1)                   # Softmax2d
    return out, [h1, h2, out]


if __name__ == "__main__":
    key = jax.random.PRNGKey(0)
    B, nz, nc, ngf, isize = 2, 8, 8, 8, 16
    # cngf as in Generator.__init__: ngf//2 doubled while tisize 4 -> isize
    cngf, tisize = ngf // 2, 4
    while tisize != isize:
        cngf, tisize = cngf * 2, tisize * 2            # -> cngf = 16

    keys = jax.random.split(key, 16)

    def nrm(k, shape, s=0.1):
        return (s * jax.random.normal(k, shape)).astype(jnp.float32)

    params = {
        # initial ConvT nz->cngf, 4, s1, p0, no bias + BN(cngf)
        'w0': nrm(keys[0], (nz, cngf, 4, 4)),
        'bn0_w': (1.0 + nrm(keys[1], (cngf,))).astype(jnp.float32),
        'bn0_b': nrm(keys[2], (cngf,)),
        # pyramid ConvT cngf->cngf//2, 4, s2, p1, no bias + BN(cngf//2)
        'w1': nrm(keys[3], (cngf, cngf // 2, 4, 4)),
        'bn1_w': (1.0 + nrm(keys[4], (cngf // 2,))).astype(jnp.float32),
        'bn1_b': nrm(keys[5], (cngf // 2,)),
        # final ConvT cngf//2 -> nc, 4, s2, p1, no bias
        'w2': nrm(keys[6], (cngf // 2, nc, 4, 4)),
        # final Self_Attn(nc): query/key 1x1 conv nc->nc//8 (bias), value nc->nc (bias)
        'wq': nrm(keys[7], (nc // 8, nc, 1, 1)), 'bq': nrm(keys[8], (nc // 8,)),
        'wk': nrm(keys[9], (nc // 8, nc, 1, 1)), 'bk': nrm(keys[10], (nc // 8,)),
        'wv': nrm(keys[11], (nc, nc, 1, 1)),     'bv': nrm(keys[12], (nc,)),
        # PyTorch inits gamma = 0; use a nonzero value so the attention branch is exercised.
        'gamma': jnp.array([0.5], jnp.float32),
    }

    z = jax.random.normal(keys[13], (B, nz), jnp.float32)

    out, hiddens = generator_forward(z, params)
    out = jax.block_until_ready(out)
    hiddens = [jax.block_until_ready(h) for h in hiddens]

    out_r, hiddens_r = generator_ref(z, params)
    out_r = jax.block_until_ready(out_r)

    assert out.shape == (B, nc, isize, isize), out.shape
    assert len(hiddens) == 3
    for got, want in zip([out] + hiddens, [out_r] + list(hiddens_r)):
        assert got.shape == want.shape, (got.shape, want.shape)
        err = float(jnp.max(jnp.abs(got - want)))
        assert jnp.allclose(got, want, rtol=2e-3, atol=2e-3), err
    print("KERNEL_OK")
</pallas_src>

<mosaic_0001>
module attributes {stable_mosaic.version = 11 : i64} {
  func.func @_convt_bn_relu_kernel(%arg0: i32, %arg1: memref<32x128xf32, #tpu.memory_space<vmem>>, %arg2: memref<128x16xf32, #tpu.memory_space<vmem>>, %arg3: memref<1x16xf32, #tpu.memory_space<vmem>>, %arg4: memref<1x16xf32, #tpu.memory_space<vmem>>, %arg5: memref<32x16xf32, #tpu.memory_space<vmem>>) attributes {dimension_semantics = [#tpu.dimension_semantics<arbitrary>], iteration_bounds = array<i64: 1>, scalar_prefetch = 0 : i64, scratch_operands = 0 : i64, tpu.core_type = #tpu.core_type<tc>, window_params = [{pipeline_mode = #tpu.pipeline_mode<synchronous>, transform_indices = @transform_0, window_bounds = array<i64: 32, 128>}, {pipeline_mode = #tpu.pipeline_mode<synchronous>, transform_indices = @transform_1, window_bounds = array<i64: 128, 16>}, {pipeline_mode = #tpu.pipeline_mode<synchronous>, transform_indices = @transform_2, window_bounds = array<i64: 1, 16>}, {pipeline_mode = #tpu.pipeline_mode<synchronous>, transform_indices = @transform_3, window_bounds = array<i64: 1, 16>}, {pipeline_mode = #tpu.pipeline_mode<synchronous>, transform_indices = @transform_4, window_bounds = array<i64: 32, 16>}]} {
    %c0 = arith.constant 0 : index
    %c0_0 = arith.constant 0 : index
    %0 = vector.load %arg1[%c0, %c0_0] : memref<32x128xf32, #tpu.memory_space<vmem>>, vector<32x128xf32>
    %c0_1 = arith.constant 0 : index
    %c0_2 = arith.constant 0 : index
    %1 = vector.load %arg2[%c0_1, %c0_2] : memref<128x16xf32, #tpu.memory_space<vmem>>, vector<128x16xf32>
    %cst = arith.constant dense<0.000000e+00> : vector<32x16xf32>
    %2 = tpu.matmul %0, %1, %cst {dimension_numbers = #tpu.dot_dimension_numbers<[1], [0], [0], [1], [0, 0, 1, 1], [], []>} : vector<32x128xf32>, vector<128x16xf32>, vector<32x16xf32> -> vector<32x16xf32>
    %cst_3 = arith.constant dense<0.000000e+00> : vector<16xf32>
    %3 = vector.multi_reduction <add>, %2, %cst_3 [0] : vector<32x16xf32> to vector<16xf32>
    %4 = vector.shape_cast %3 : vector<16xf32> to vector<1x16xf32>
    %cst_4 = arith.constant 3.125000e-02 : f32
    %5 = vector.broadcast %cst_4 : f32 to vector<1x16xf32>
    %6 = arith.mulf %4, %5 : vector<1x16xf32>
    %7 = vector.broadcast %6 : vector<1x16xf32> to vector<32x16xf32>
    %8 = arith.subf %2, %7 : vector<32x16xf32>
    %9 = arith.mulf %8, %8 : vector<32x16xf32>
    %cst_5 = arith.constant dense<0.000000e+00> : vector<16xf32>
    %10 = vector.multi_reduction <add>, %9, %cst_5 [0] : vector<32x16xf32> to vector<16xf32>
    %11 = vector.shape_cast %10 : vector<16xf32> to vector<1x16xf32>
    %cst_6 = arith.constant 3.125000e-02 : f32
    %12 = vector.broadcast %cst_6 : f32 to vector<1x16xf32>
    %13 = arith.mulf %11, %12 : vector<1x16xf32>
    %cst_7 = arith.constant 9.99999974E-6 : f32
    %14 = vector.broadcast %cst_7 : f32 to vector<1x16xf32>
    %15 = arith.addf %13, %14 : vector<1x16xf32>
    %16 = math.rsqrt %15 : vector<1x16xf32>
    %17 = vector.broadcast %16 : vector<1x16xf32> to vector<32x16xf32>
    %18 = arith.mulf %8, %17 : vector<32x16xf32>
    %c0_8 = arith.constant 0 : index
    %c0_9 = arith.constant 0 : index
    %19 = vector.load %arg3[%c0_8, %c0_9] : memref<1x16xf32, #tpu.memory_space<vmem>>, vector<1x16xf32>
    %20 = vector.broadcast %19 : vector<1x16xf32> to vector<32x16xf32>
    %21 = arith.mulf %18, %20 : vector<32x16xf32>
    %c0_10 = arith.constant 0 : index
    %c0_11 = arith.constant 0 : index
    %22 = vector.load %arg4[%c0_10, %c0_11] : memref<1x16xf32, #tpu.memory_space<vmem>>, vector<1x16xf32>
    %23 = vector.broadcast %22 : vector<1x16xf32> to vector<32x16xf32>
    %24 = arith.addf %21, %23 : vector<32x16xf32>
    %cst_12 = arith.constant 0.000000e+00 : f32
    %25 = vector.broadcast %cst_12 : f32 to vector<32x16xf32>
    %26 = arith.maximumf %24, %25 : vector<32x16xf32>
    %c0_13 = arith.constant 0 : index
    %c0_14 = arith.constant 0 : index
    %27 = vector.load %arg5[%c0_13, %c0_14] : memref<32x16xf32, #tpu.memory_space<vmem>>, vector<32x16xf32>
    tpu.vector_store %arg5[%c0_13, %c0_14], %26 {strides = array<i32>} : memref<32x16xf32, #tpu.memory_space<vmem>>, vector<32x16xf32>,
    return
  }
  func.func @transform_0(%arg0: i32) -> (i32, i32) {
    %c0_i32 = arith.constant 0 : i32
    %c0_i32_0 = arith.constant 0 : i32
    %c0_i32_1 = arith.constant 0 : i32
    return %c0_i32, %c0_i32_0 : i32, i32
  }
  func.func @transform_1(%arg0: i32) -> (i32, i32) {
    %c0_i32 = arith.constant 0 : i32
    %c0_i32_0 = arith.constant 0 : i32
    %c0_i32_1 = arith.constant 0 : i32
    return %c0_i32, %c0_i32_0 : i32, i32
  }
  func.func @transform_2(%arg0: i32) -> (i32, i32) {
    %c0_i32 = arith.constant 0 : i32
    %c0_i32_0 = arith.constant 0 : i32
    %c0_i32_1 = arith.constant 0 : i32
    return %c0_i32, %c0_i32_0 : i32, i32
  }
  func.func @transform_3(%arg0: i32) -> (i32, i32) {
    %c0_i32 = arith.constant 0 : i32
    %c0_i32_0 = arith.constant 0 : i32
    %c0_i32_1 = arith.constant 0 : i32
    return %c0_i32, %c0_i32_0 : i32, i32
  }
  func.func @transform_4(%arg0: i32) -> (i32, i32) {
    %c0_i32 = arith.constant 0 : i32
    %c0_i32_0 = arith.constant 0 : i32
    %c0_i32_1 = arith.constant 0 : i32
    return %c0_i32, %c0_i32_0 : i32, i32
  }
}

</mosaic_0001>

<bundles_post_ra>
// kernel: tpu_custom_call.1
= control target key start
LH: loop header
LB: loop body
LE: loop exit
PB: predicated region body
PF: predicated region fallthrough
CT: control target
= control target key end

     0   :  { %vm122_vm0 = vcmask 130048   ;;  %s424_s1 = inlined_call_operand.vmem [shape: f32[128,16], index: 1, kind: input, shape index: {}]   ;;  %s425_s0 = inlined_call_operand.vmem [shape: f32[32,128], index: 0, kind: input, shape index: {}]   ;;  %s426_s2 = inlined_call_operand.vmem [shape: f32[1,16], index: 2, kind: input, shape index: {}]   ;;  %s427_s3 = inlined_call_operand.vmem [shape: f32[1,16], index: 3, kind: input, shape index: {}]   ;;  %s428_s4 = inlined_call_operand.vmem [shape: f32[32,16], index: 4, kind: output, shape index: {}]  }
   0x1   :  { %v21_v0 = vld [vmem:[%s424_s1] sm:$0xff]  ;;  %v22_v1 = vld [vmem:[%s424_s1 + $0x8] sm:$0xff]  ;;  %v23_v2 = vld [vmem:[%s424_s1 + $0x10] sm:$0xff] }
   0x2   :  { %v259_v3 = vpack.c.bf16 %v22_v1, %v21_v0  ;;  %v24_v4 = vld [vmem:[%s424_s1 + $0x18] sm:$0xff]  ;;  %v25_v6 = vld [vmem:[%s424_s1 + $0x20] sm:$0xff]  ;;  %v26_v7 = vld [vmem:[%s424_s1 + $0x28] sm:$0xff] }
   0x3   :  { %v263_v5 = vpack.c.bf16 %v24_v4, %v23_v2  ;;  %v267_v8 = vpack.c.bf16 %v26_v7, %v25_v6  ;;  %v17_v9 = vld [vmem:[%s425_s0] sm:$0xff]  ;;  %v27_v10 = vld [vmem:[%s424_s1 + $0x30] sm:$0xff]  ;;  %v28_v11 = vld [vmem:[%s424_s1 + $0x38] sm:$0xff] }
   0x4   :  { %260 = vmatprep.subr.bf16.mxu0 %v259_v3  ;;  %291 = vmatprep.subr.bf16.mxu1 %v259_v3  ;;  %v19_v12 = vld [vmem:[%s425_s0 + $0x10] sm:$0xff]  ;;  %v271_v13 = vpack.c.bf16 %v28_v11, %v27_v10  ;;  %v29_v14 = vld [vmem:[%s424_s1 + $0x40] sm:$0xff]  ;;  %v30_v15 = vld [vmem:[%s424_s1 + $0x48] sm:$0xff] }
   0x5   :  { %262 = vmatpush3.bf16.msra.mxu0 %v259_v3  ;;  %299 = vmatpush3.bf16.msra.mxu1 %v259_v3  ;;  %v275_v16 = vpack.c.bf16 %v30_v15, %v29_v14  ;;  %v31_v17 = vld [vmem:[%s424_s1 + $0x50] sm:$0xff]  ;;  %v32_v18 = vld [vmem:[%s424_s1 + $0x58] sm:$0xff]  ;;  %v33_v20 = vld [vmem:[%s424_s1 + $0x60] sm:$0xff] }
   0x6   :  { %264 = vmatprep.subr.bf16.mxu0 %v263_v5  ;;  %292 = vmatprep.subr.bf16.mxu1 %v263_v5  ;;  %v279_v19 = vpack.c.bf16 %v32_v18, %v31_v17  ;;  %v34_v21 = vld [vmem:[%s424_s1 + $0x68] sm:$0xff]  ;;  %v35_v23 = vld [vmem:[%s424_s1 + $0x70] sm:$0xff]  ;;  %v36_v24 = vld [vmem:[%s424_s1 + $0x78] sm:$0xff] }
   0x7   :  { %253 = vmatprep.mubr.f32.mxu0 %v17_v9  ;;  %256 = vmatprep.mubr.f32.mxu1 %v19_v12  ;;  %v283_v22 = vpack.c.bf16 %v34_v21, %v33_v20  ;;  %v287_v25 = vpack.c.bf16 %v36_v24, %v35_v23  ;;  %v18_v26 = vld [vmem:[%s425_s0 + $0x8] sm:$0xff]  ;;  %v20_v27 = vld [vmem:[%s425_s0 + $0x18] sm:$0xff]  ;;  %v199_v6 = vld [vmem:[%s426_s2] ss:$0 sm:$0xff] }
   0x8   :  { %v200_v11 = vld [vmem:[%s427_s3] ss:$0 sm:$0xff] }
   0x9   :  { %266 = vmatpush3.bf16.msra.mxu0 %v263_v5  ;;  %300 = vmatpush3.bf16.msra.mxu1 %v263_v5 }
   0xa   :  { %268 = vmatprep.subr.bf16.mxu0 %v267_v8  ;;  %293 = vmatprep.subr.bf16.mxu1 %v267_v8 }
   0xd   :  { %270 = vmatpush3.bf16.msra.mxu0 %v267_v8  ;;  %301 = vmatpush3.bf16.msra.mxu1 %v267_v8 }
   0xe   :  { %272 = vmatprep.subr.bf16.mxu0 %v271_v13  ;;  %294 = vmatprep.subr.bf16.mxu1 %v271_v13 }
  0x11   :  { %274 = vmatpush3.bf16.msra.mxu0 %v271_v13  ;;  %302 = vmatpush3.bf16.msra.mxu1 %v271_v13 }
  0x12   :  { %276 = vmatprep.subr.bf16.mxu0 %v275_v16  ;;  %295 = vmatprep.subr.bf16.mxu1 %v275_v16 }
  0x15   :  { %278 = vmatpush3.bf16.msra.mxu0 %v275_v16  ;;  %303 = vmatpush3.bf16.msra.mxu1 %v275_v16 }
  0x16   :  { %280 = vmatprep.subr.bf16.mxu0 %v279_v19  ;;  %296 = vmatprep.subr.bf16.mxu1 %v279_v19 }
  0x19   :  { %282 = vmatpush3.bf16.msra.mxu0 %v279_v19  ;;  %304 = vmatpush3.bf16.msra.mxu1 %v279_v19 }
  0x1a   :  { %284 = vmatprep.subr.bf16.mxu0 %v283_v22  ;;  %297 = vmatprep.subr.bf16.mxu1 %v283_v22 }
  0x1d   :  { %286 = vmatpush3.bf16.msra.mxu0 %v283_v22  ;;  %305 = vmatpush3.bf16.msra.mxu1 %v283_v22 }
  0x1e   :  { %288 = vmatprep.subr.bf16.mxu0 %v287_v25  ;;  %298 = vmatprep.subr.bf16.mxu1 %v287_v25 }
  0x21   :  { %290 = vmatpush3.bf16.msra.mxu0 %v287_v25  ;;  %306 = vmatpush3.bf16.msra.mxu1 %v287_v25 }
  0x24   :  { %254 = vmatmul.mubr.f32.vlgmr.msra.gmra.mrb[0].mxu0 %v18_v26  ;;  %257 = vmatmul.mubr.f32.vlgmr.msra.gmra.mrb[0].mxu1 %v20_v27 }
  0xf7   :  { %v255_v28 = vpop.f32.mrb[0].mxu0  ;;  %v258_v29 = vpop.f32.mrb[0].mxu1 }
  0xf8   :  { %v124_v30 = vsel %vm122_vm0, %v255_v28, 0.0  ;;  %v103_v31 = vpop.f32.mrb[1].mxu0  ;;  %v113_v32 = vpop.f32.mrb[1].mxu1  ;;  %v128_v37 = vsel %vm122_vm0, %v258_v29, 0.0 }
  0xf9   :  { %v123_v33 = vsel %vm122_vm0, %v103_v31, 0.0  ;;  %v126_v34 = vsel %vm122_vm0, %v113_v32, 0.0 }
  0xfa   :  { %v125_v35 = vadd.f32 %v124_v30, %v123_v33 }
  0xfc   :  { %v127_v36 = vadd.f32 %v126_v34, %v125_v35 }
  0xfe   :  { %v129_v38 = vadd.f32 %v128_v37, %v127_v36 }
 0x100   :  { %v130_v39 = vrot.slane %v129_v38, 4 }
 0x102   :  { %v131_v40 = vadd.f32 %v130_v39, %v129_v38 }
 0x104   :  { %v132_v41 = vrot.slane %v131_v40, 2 }
 0x106   :  { %v133_v42 = vadd.f32 %v132_v41, %v131_v40 }
 0x108   :  { %v134_v43 = vrot.slane %v133_v42, 1 }
 0x10a   :  { %v135_v44 = vadd.f32 %v134_v43, %v133_v42 }
 0x10c   :  { %v136_v45 = vmul.f32 0.03125, %v135_v44 }
 0x10e   :  { %v137_v46 = vsub.f32 %v103_v31, %v136_v45  ;;  %v138_v47 = vsub.f32 %v255_v28, %v136_v45  ;;  %v139_v48 = vsub.f32 %v113_v32, %v136_v45  ;;  %v140_v49 = vsub.f32 %v258_v29, %v136_v45 }
 0x110   :  { %v141_v50 = vmul.f32 %v137_v46, %v137_v46  ;;  %v142_v51 = vmul.f32 %v138_v47, %v138_v47  ;;  %v143_v52 = vmul.f32 %v139_v48, %v139_v48  ;;  %v144_v53 = vmul.f32 %v140_v49, %v140_v49 }
 0x112   :  { %v145_v54 = vsel %vm122_vm0, %v141_v50, 0.0  ;;  %v146_v55 = vsel %vm122_vm0, %v142_v51, 0.0  ;;  %v148_v57 = vsel %vm122_vm0, %v143_v52, 0.0  ;;  %v150_v59 = vsel %vm122_vm0, %v144_v53, 0.0 }
 0x113   :  { %v147_v56 = vadd.f32 %v146_v55, %v145_v54 }
 0x115   :  { %v149_v58 = vadd.f32 %v148_v57, %v147_v56 }
 0x117   :  { %v151_v60 = vadd.f32 %v150_v59, %v149_v58 }
 0x119   :  { %v152_v61 = vrot.slane %v151_v60, 4 }
 0x11b   :  { %v153_v62 = vadd.f32 %v152_v61, %v151_v60 }
 0x11d   :  { %v154_v63 = vrot.slane %v153_v62, 2 }
 0x11f   :  { %v155_v0 = vadd.f32 %v154_v63, %v153_v62 }
 0x121   :  { %v156_v1 = vrot.slane %v155_v0, 1 }
 0x123   :  { %v157_v2 = vadd.f32 %v156_v1, %v155_v0 }
 0x125   :  { %v158_v3 = vmul.f32 0.03125, %v157_v2 }
 0x127   :  { %v159_v4 = vadd.f32 1e-05, %v158_v3 }
 0x129   :  { %307 = vrsqrt.f32 %v159_v4 }
 0x133   :  { %v308_v5 = vpop.eup %307 }
 0x134   :  { %v161_v7 = vmul.f32 %v308_v5, %v137_v46  ;;  %v162_v8 = vmul.f32 %v308_v5, %v138_v47  ;;  %v163_v9 = vmul.f32 %v308_v5, %v139_v48  ;;  %v164_v10 = vmul.f32 %v308_v5, %v140_v49 }
 0x136   :  { %v172_v12 = vmul.f32 %v199_v6, %v161_v7  ;;  %v173_v13 = vmul.f32 %v199_v6, %v162_v8  ;;  %v174_v14 = vmul.f32 %v199_v6, %v163_v9  ;;  %v175_v15 = vmul.f32 %v199_v6, %v164_v10 }
 0x138   :  { %v183_v16 = vadd.f32 %v200_v11, %v172_v12  ;;  %v184_v17 = vadd.f32 %v200_v11, %v173_v13  ;;  %v185_v18 = vadd.f32 %v200_v11, %v174_v14  ;;  %v186_v19 = vadd.f32 %v200_v11, %v175_v15 }
 0x13a   :  { %v187_v20 = vmax.f32 %v183_v16, 0.0  ;;  %v188_v21 = vmax.f32 %v184_v17, 0.0  ;;  %v189_v22 = vmax.f32 %v185_v18, 0.0  ;;  %v190_v23 = vmax.f32 %v186_v19, 0.0 }
 0x13c   :  { %191 = vst.msk [vmem:[%s428_s4] sm:$0xff] %vm122_vm0, %v187_v20  ;;  %192 = vst.msk [vmem:[%s428_s4 + $0x8] sm:$0xff] %vm122_vm0, %v188_v21 }
 0x13d   :  { %193 = vst.msk [vmem:[%s428_s4 + $0x10] sm:$0xff] %vm122_vm0, %v189_v22  ;;  %194 = vst.msk [vmem:[%s428_s4 + $0x18] sm:$0xff] %vm122_vm0, %v190_v23 }

</bundles_post_ra>
